<compile_context>
chip_gen: v7x
topology: tpu7x:2x2x1
jax: 0.10.0
libtpu: 0.0.40
codegen_flags: <defaults>
</compile_context>

<pallas_src>
import functools

import jax
import jax.numpy as jnp
from jax.experimental import pallas as pl
from jax.experimental.pallas import tpu as pltpu

_IGNORE_INDEX = -100  # torch.nn.CrossEntropyLoss default.


def _ce_partial_kernel(pred_ref, tgt_ref, out_ref, *, label_smoothing, n_total,
                       tile_n, ignore_index):
    # pred_ref : (tile_n, C) logits (input dtype), class axis on lanes.
    # tgt_ref  : (tile_n, 1) int32 class indices.
    # out_ref  : (1, 8, 128) f32 partial slab: [0,0,0] = loss sum, [0,1,0] = count.
    i = pl.program_id(0)

    logits = pred_ref[...].astype(jnp.float32)                        # (tn, C)
    tn, c = logits.shape
    tgt = tgt_ref[...]                                                # (tn, 1)

    # Numerically-stable log-sum-exp over the class (lane) axis.
    row_max = jnp.max(logits, axis=-1, keepdims=True)                 # (tn, 1)
    shifted = logits - row_max                                        # (tn, C)
    lse = jnp.log(jnp.sum(jnp.exp(shifted), axis=-1, keepdims=True))  # (tn, 1)

    # log_softmax = shifted - lse is never materialized:
    #   nll    = lse - shifted[target]
    #   smooth = lse - mean_c(shifted)
    class_iota = jax.lax.broadcasted_iota(jnp.int32, (tn, c), 1)      # (tn, C)
    picked = jnp.sum(jnp.where(class_iota == tgt, shifted, 0.0),
                     axis=-1, keepdims=True)                          # (tn, 1)
    nll = lse - picked                                                # (tn, 1)

    if label_smoothing == 0.0:
        per_point = nll
    else:
        eps = jnp.float32(label_smoothing)
        sum_shifted = jnp.sum(shifted, axis=-1, keepdims=True)        # (tn, 1)
        smooth = lse - sum_shifted * jnp.float32(1.0 / c)
        per_point = (jnp.float32(1.0) - eps) * nll + eps * smooth     # (tn, 1)

    # Mask (a) padded rows of the last partial tile, (b) ignore_index targets.
    row_iota = jax.lax.broadcasted_iota(jnp.int32, (tn, 1), 0)
    global_row = i * tile_n + row_iota
    valid = (global_row < n_total) & (tgt != ignore_index)            # (tn, 1)

    loss_sum = jnp.sum(jnp.where(valid, per_point, 0.0),
                       axis=(0, 1), keepdims=True)                    # (1, 1)
    count = jnp.sum(valid.astype(jnp.float32),
                    axis=(0, 1), keepdims=True)                       # (1, 1)

    # Lane-dense output slab (avoids a masked 1-lane store).
    out_iota = jax.lax.broadcasted_iota(jnp.int32, (8, 128), 0)
    slab = jnp.where(out_iota == 0, loss_sum,
                     jnp.where(out_iota == 1, count, jnp.float32(0.0)))
    out_ref[...] = slab[None, :, :]


def _choose_tile_n(n, c):
    # Target ~3 MiB of (lane-padded) VMEM per logits buffer (double-buffered ->
    # ~6 MiB, safely inside the default scoped-VMEM limit on all chips), capped
    # at 4096 rows, multiple of 8 sublanes. Small inputs use one full block.
    lane_padded_c = ((c + 127) // 128) * 128
    max_rows = ((3 << 20) // (lane_padded_c * 4)) // 8 * 8
    tile = max(8, min(4096, max_rows))
    return n if n <= tile else tile


def pointnetv2_loss_for_semantic_segmentation(predictions, targets,
                                              ce_label_smoothing=0.0,
                                              weights=None, tile_n=None):
    """JAX/Pallas equivalent of PointNetV2LossForSemanticSegmentation.forward.

    predictions: (B, P, C) float logits (class axis last, as fed to the module)
    targets:     (B, P)   integer class indices (ignore_index=-100 supported)
    returns:     scalar float32 loss
    """
    if weights is not None:
        # TODO(synk): per-class weight path (nn.CrossEntropyLoss(weight=...)) not implemented.
        raise NotImplementedError("class weights are not supported in the Pallas kernel")

    b, p, c = predictions.shape
    n = b * p
    pred2 = predictions.reshape(n, c)                # keep input dtype; cast in-kernel
    tgt2 = targets.reshape(n, 1).astype(jnp.int32)

    if tile_n is None:
        tile_n = _choose_tile_n(n, c)
    num_tiles = pl.cdiv(n, tile_n)

    kernel = functools.partial(
        _ce_partial_kernel,
        label_smoothing=float(ce_label_smoothing),
        n_total=n, tile_n=tile_n, ignore_index=_IGNORE_INDEX)

    bytes_in = n * c * pred2.dtype.itemsize + n * 4
    bytes_out = num_tiles * 8 * 128 * 4
    cost = pl.CostEstimate(
        flops=6 * n * c,                         # sub/exp-arg/cmp/select/sums
        transcendentals=n * c + n,               # exp per element + log per row
        bytes_accessed=bytes_in + bytes_out)

    partials = pl.pallas_call(
        kernel,
        out_shape=jax.ShapeDtypeStruct((num_tiles, 8, 128), jnp.float32),
        grid=(num_tiles,),
        in_specs=[
            pl.BlockSpec((tile_n, c), lambda i: (i, 0)),   # logits tile
            pl.BlockSpec((tile_n, 1), lambda i: (i, 0)),   # targets tile
        ],
        out_specs=pl.BlockSpec((1, 8, 128), lambda i: (i, 0, 0)),
        compiler_params=pltpu.CompilerParams(
            dimension_semantics=("parallel",)),
        cost_estimate=cost,
    )(pred2, tgt2)

    loss_sum = jnp.sum(partials[:, 0, 0])
    valid_count = jnp.sum(partials[:, 1, 0])
    return loss_sum / valid_count


def _reference_loss(predictions, targets, eps=0.0, ignore_index=_IGNORE_INDEX):
    # Pure-JAX reference mirroring torch CE (mean, label smoothing, ignore_index).
    n_cls = predictions.shape[-1]
    logits = predictions.reshape(-1, n_cls).astype(jnp.float32)
    tgt = targets.reshape(-1)
    logp = jax.nn.log_softmax(logits, axis=-1)
    n = logits.shape[0]
    safe_tgt = jnp.where(tgt == ignore_index, 0, tgt)
    nll = -logp[jnp.arange(n), safe_tgt]
    smooth = -jnp.mean(logp, axis=-1)
    per = (1.0 - eps) * nll + eps * smooth
    valid = (tgt != ignore_index)
    return jnp.sum(jnp.where(valid, per, 0.0)) / jnp.sum(valid.astype(jnp.float32))


if __name__ == "__main__":
    key = jax.random.PRNGKey(0)
    k1, k2, k3, k4 = jax.random.split(key, 4)

    # Case 1: (B=2, P=64, C=16), label smoothing, multi-tile grid (tile_n=64).
    B, P, C = 2, 64, 16
    preds = jax.random.normal(k1, (B, P, C), dtype=jnp.float32)
    tgts = jax.random.randint(k2, (B, P), 0, C, dtype=jnp.int32)
    loss = pointnetv2_loss_for_semantic_segmentation(
        preds, tgts, ce_label_smoothing=0.1, tile_n=64)
    loss = jax.block_until_ready(loss)
    ref = _reference_loss(preds, tgts, eps=0.1)
    assert jnp.allclose(loss, ref, atol=1e-4, rtol=1e-4), (loss, ref)

    # Case 2: N=120 (partial last tile) + one ignore_index target, no smoothing.
    B2, P2, C2 = 2, 60, 13
    preds2 = jax.random.normal(k3, (B2, P2, C2), dtype=jnp.float32)
    tgts2 = jax.random.randint(k4, (B2, P2), 0, C2, dtype=jnp.int32)
    tgts2 = tgts2.at[0, 3].set(_IGNORE_INDEX)
    loss2 = pointnetv2_loss_for_semantic_segmentation(
        preds2, tgts2, ce_label_smoothing=0.0, tile_n=64)
    loss2 = jax.block_until_ready(loss2)
    ref2 = _reference_loss(preds2, tgts2, eps=0.0)
    assert jnp.allclose(loss2, ref2, atol=1e-4, rtol=1e-4), (loss2, ref2)

    # Case 3: default (auto) tile choice, single full-block path.
    loss3 = pointnetv2_loss_for_semantic_segmentation(
        preds, tgts, ce_label_smoothing=0.1)
    loss3 = jax.block_until_ready(loss3)
    assert jnp.allclose(loss3, ref, atol=1e-4, rtol=1e-4), (loss3, ref)

    print("KERNEL_OK")
</pallas_src>

<mosaic_0001>
module attributes {stable_mosaic.version = 11 : i64} {
  func.func @_ce_partial_kernel(%arg0: i32, %arg1: memref<64x16xf32, #tpu.memory_space<vmem>>, %arg2: memref<64x1xi32, #tpu.memory_space<vmem>>, %arg3: memref<1x8x128xf32, #tpu.memory_space<vmem>>) attributes {dimension_semantics = [#tpu.dimension_semantics<parallel>], iteration_bounds = array<i64: 2>, scalar_prefetch = 0 : i64, scratch_operands = 0 : i64, tpu.core_type = #tpu.core_type<tc>, window_params = [{transform_indices = @transform_0, window_bounds = array<i64: 64, 16>}, {transform_indices = @transform_1, window_bounds = array<i64: 64, 1>}, {transform_indices = @transform_2, window_bounds = array<i64: 1, 8, 128>}]} {
    %c0 = arith.constant 0 : index
    %c0_0 = arith.constant 0 : index
    %0 = vector.load %arg1[%c0, %c0_0] : memref<64x16xf32, #tpu.memory_space<vmem>>, vector<64x16xf32>
    %c0_1 = arith.constant 0 : index
    %c0_2 = arith.constant 0 : index
    %1 = vector.load %arg2[%c0_1, %c0_2] : memref<64x1xi32, #tpu.memory_space<vmem>>, vector<64x1xi32>
    %cst = arith.constant dense<0xFF800000> : vector<64xf32>
    %2 = vector.multi_reduction <maximumf>, %0, %cst [1] : vector<64x16xf32> to vector<64xf32>
    %3 = vector.shape_cast %2 : vector<64xf32> to vector<64x1xf32>
    %4 = vector.broadcast %3 : vector<64x1xf32> to vector<64x16xf32>
    %5 = arith.subf %0, %4 : vector<64x16xf32>
    %6 = math.exp %5 : vector<64x16xf32>
    %cst_3 = arith.constant dense<0.000000e+00> : vector<64xf32>
    %7 = vector.multi_reduction <add>, %6, %cst_3 [1] : vector<64x16xf32> to vector<64xf32>
    %8 = vector.shape_cast %7 : vector<64xf32> to vector<64x1xf32>
    %9 = math.log %8 : vector<64x1xf32>
    %10 = tpu.iota {dimensions = array<i32: 1>} : vector<64x16xi32>
    %11 = vector.broadcast %1 : vector<64x1xi32> to vector<64x16xi32>
    %12 = arith.cmpi eq, %10, %11 : vector<64x16xi32>
    %cst_4 = arith.constant 0.000000e+00 : f32
    %13 = vector.broadcast %cst_4 : f32 to vector<64x16xf32>
    %14 = arith.select %12, %5, %13 : vector<64x16xi1>, vector<64x16xf32>
    %cst_5 = arith.constant dense<0.000000e+00> : vector<64xf32>
    %15 = vector.multi_reduction <add>, %14, %cst_5 [1] : vector<64x16xf32> to vector<64xf32>
    %16 = vector.shape_cast %15 : vector<64xf32> to vector<64x1xf32>
    %17 = arith.subf %9, %16 : vector<64x1xf32>
    %cst_6 = arith.constant dense<0.000000e+00> : vector<64xf32>
    %18 = vector.multi_reduction <add>, %5, %cst_6 [1] : vector<64x16xf32> to vector<64xf32>
    %19 = vector.shape_cast %18 : vector<64xf32> to vector<64x1xf32>
    %cst_7 = arith.constant 6.250000e-02 : f32
    %20 = vector.broadcast %cst_7 : f32 to vector<64x1xf32>
    %21 = arith.mulf %19, %20 : vector<64x1xf32>
    %22 = arith.subf %9, %21 : vector<64x1xf32>
    %cst_8 = arith.constant 1.000000e+00 : f32
    %cst_9 = arith.constant 1.000000e-01 : f32
    %23 = arith.subf %cst_8, %cst_9 : f32
    %24 = vector.broadcast %23 : f32 to vector<64x1xf32>
    %25 = arith.mulf %24, %17 : vector<64x1xf32>
    %cst_10 = arith.constant 1.000000e-01 : f32
    %26 = vector.broadcast %cst_10 : f32 to vector<64x1xf32>
    %27 = arith.mulf %26, %22 : vector<64x1xf32>
    %28 = arith.addf %25, %27 : vector<64x1xf32>
    %29 = tpu.iota {dimensions = array<i32: 0>} : vector<64x1xi32>
    %c64_i32 = arith.constant 64 : i32
    %30 = arith.muli %arg0, %c64_i32 : i32
    %31 = vector.broadcast %30 : i32 to vector<64x1xi32>
    %32 = arith.addi %31, %29 : vector<64x1xi32>
    %c128_i32 = arith.constant 128 : i32
    %33 = vector.broadcast %c128_i32 : i32 to vector<64x1xi32>
    %34 = arith.cmpi slt, %32, %33 : vector<64x1xi32>
    %c-100_i32 = arith.constant -100 : i32
    %35 = vector.broadcast %c-100_i32 : i32 to vector<64x1xi32>
    %36 = arith.cmpi ne, %1, %35 : vector<64x1xi32>
    %37 = arith.andi %34, %36 : vector<64x1xi1>
    %cst_11 = arith.constant 0.000000e+00 : f32
    %38 = vector.broadcast %cst_11 : f32 to vector<64x1xf32>
    %39 = arith.select %37, %28, %38 : vector<64x1xi1>, vector<64x1xf32>
    %40 = vector.shape_cast %39 : vector<64x1xf32> to vector<1x64x1xf32>
    %cst_12 = arith.constant dense<0.000000e+00> : vector<1xf32>
    %41 = vector.multi_reduction <add>, %40, %cst_12 [1, 2] : vector<1x64x1xf32> to vector<1xf32>
    %42 = vector.shape_cast %41 : vector<1xf32> to vector<1x1x1xf32>
    %43 = vector.extract %42[0, 0, 0] : f32 from vector<1x1x1xf32>
    %44 = vector.broadcast %43 : f32 to vector<1x1xf32>
    %45 = arith.extui %37 : vector<64x1xi1> to vector<64x1xi32>
    %46 = arith.sitofp %45 : vector<64x1xi32> to vector<64x1xf32>
    %47 = vector.shape_cast %46 : vector<64x1xf32> to vector<1x64x1xf32>
    %cst_13 = arith.constant dense<0.000000e+00> : vector<1xf32>
    %48 = vector.multi_reduction <add>, %47, %cst_13 [1, 2] : vector<1x64x1xf32> to vector<1xf32>
    %49 = vector.shape_cast %48 : vector<1xf32> to vector<1x1x1xf32>
    %50 = vector.extract %49[0, 0, 0] : f32 from vector<1x1x1xf32>
    %51 = vector.broadcast %50 : f32 to vector<1x1xf32>
    %52 = tpu.iota {dimensions = array<i32: 0>} : vector<8x128xi32>
    %c0_i32 = arith.constant 0 : i32
    %53 = vector.broadcast %c0_i32 : i32 to vector<8x128xi32>
    %54 = arith.cmpi eq, %52, %53 : vector<8x128xi32>
    %c1_i32 = arith.constant 1 : i32
    %55 = vector.broadcast %c1_i32 : i32 to vector<8x128xi32>
    %56 = arith.cmpi eq, %52, %55 : vector<8x128xi32>
    %cst_14 = arith.constant 0.000000e+00 : f32
    %57 = vector.shape_cast %51 : vector<1x1xf32> to vector<1x1xf32>
    %58 = vector.broadcast %57 : vector<1x1xf32> to vector<8x128xf32>
    %59 = vector.broadcast %cst_14 : f32 to vector<8x128xf32>
    %60 = arith.select %56, %58, %59 : vector<8x128xi1>, vector<8x128xf32>
    %61 = vector.shape_cast %44 : vector<1x1xf32> to vector<1x1xf32>
    %62 = vector.broadcast %61 : vector<1x1xf32> to vector<8x128xf32>
    %63 = arith.select %54, %62, %60 : vector<8x128xi1>, vector<8x128xf32>
    %64 = vector.shape_cast %63 : vector<8x128xf32> to vector<1x8x128xf32>
    %c0_15 = arith.constant 0 : index
    %c0_16 = arith.constant 0 : index
    %c0_17 = arith.constant 0 : index
    %65 = vector.load %arg3[%c0_15, %c0_16, %c0_17] : memref<1x8x128xf32, #tpu.memory_space<vmem>>, vector<1x8x128xf32>
    tpu.vector_store %arg3[%c0_15, %c0_16, %c0_17], %64 {strides = array<i32>} : memref<1x8x128xf32, #tpu.memory_space<vmem>>, vector<1x8x128xf32>,
    return
  }
  func.func @transform_0(%arg0: i32) -> (i32, i32) {
    %c0_i32 = arith.constant 0 : i32
    %c0_i32_0 = arith.constant 0 : i32
    return %arg0, %c0_i32 : i32, i32
  }
  func.func @transform_1(%arg0: i32) -> (i32, i32) {
    %c0_i32 = arith.constant 0 : i32
    %c0_i32_0 = arith.constant 0 : i32
    return %arg0, %c0_i32 : i32, i32
  }
  func.func @transform_2(%arg0: i32) -> (i32, i32, i32) {
    %c0_i32 = arith.constant 0 : i32
    %c0_i32_0 = arith.constant 0 : i32
    %c0_i32_1 = arith.constant 0 : i32
    return %arg0, %c0_i32, %c0_i32_0 : i32, i32, i32
  }
}

</mosaic_0001>

<bundles_post_ra>
// kernel: tpu_custom_call.1
= control target key start
LH: loop header
LB: loop body
LE: loop exit
PB: predicated region body
PF: predicated region fallthrough
CT: control target
= control target key end

     0   :  { %7 = vsyncpa [#allocation3], 0  ;;  %s1111_s0 = inlined_call_operand.vmem [shape: f32[128,16], index: 0, kind: input, shape index: {}]   ;;  %s1112_s1 = inlined_call_operand.vmem [shape: s32[128,1], index: 1, kind: input, shape index: {}]   ;;  %s1113_s2 = inlined_call_operand.hbm [shape: f32[2,8,128], index: 2, kind: output, shape index: {}]  }
   0x1   :  { %9 = vsyncpa [#allocation3 + $0x1], 0  ;;  %s800_s9 = smov 0   ;;  %s802_s10 = smov 0  }
   0x2   :  { %s804_s11 = smov 0   ;;  %s806_s12 = smov 0  }
   0x3 LB: > { %s821_s13 = sadd.s32 4294967295, %s780_s12   ;;  %s617_s14 = sadd.s32 4294967294, %s780_s12   ;;  %s780_s12 = sphi %s806_s12, %s1135_s12   ;;  %s776_s11 = sphi %s804_s11, %s1134_s11   ;;  %s772_s10 = sphi %s802_s10, %s1133_s10   ;;  %s768_s9 = sphi %s800_s9, %s1132_s9  }
   0x4   : > { %s825_s15 = sadd.s32 1, %s780_s12   ;;  %s74_s16 = sadd.s32 1, %s776_s11 }
   0x5   : > { %s71_s17 = ssub.s32 %s780_s12, %s825_s15  ;;  %p84_p0 = scmp.ne.s32.totalorder %s776_s11, %s772_s10 }
   0x6   : > { %p72_p1 = scmp.eq.s32.totalorder %s71_s17, 0  ;;  %p85_p2 = scmp.eq.s32.totalorder %s821_s13, 1 }
   0x7   : > { %p90_p3 = scmp.ne.s32.totalorder %s772_s10, %s768_s9  ;;  %p91_p4 = scmp.eq.s32.totalorder %s617_s14, 1 }
   0x8   : > { %s836_s18 = scalar_select %p72_p1, %s776_s11, %s74_s16  }
   0x9   : > { %p838_p5 = por %p85_p2, %p84_p0  ;;  %p842_p6 = por %p91_p4, %p90_p3 }
   0xa   : > { %p620_p7 = scmp.ge.s32.totalorder %s780_s12, 1  ;;  %p127_p8 = scmp.lt.s32.totalorder %s780_s12, 3 }
   0xc   : > { %p128_p9 = pnand %p620_p7, %p127_p8 }
   0xd   : > { %s622_s21 = sshll.u32 (!%p128_p9), %s821_s13, 3  ;;  %v782_v0 = vmov (!%p128_p9), 0   ;;  %vm182_vm0 = vcmask (!%p128_p9), 130048   ;;  %v271_v35 = vlaneseq (!%p128_p9)  ;;  %s626_s29 = sshll.u32 (!%p128_p9), %s821_s13, 6 }
   0xe   : > { %131 = sbr.rel (%p128_p9) target bundleno = 601 (0x259), region = 28  ;;  %p155_p10 = scmp.lt.s32.totalorder (!%p128_p9), %s622_s21, 15  ;;  %685 = vset.pattern.permute.xlu1 (!%p128_p9), %v782_v0  ;;  %684 = vset.pattern.permute.xlu0 (!%p128_p9), %v782_v0 }
   0xf   : > { %v897_v42 = vand.u32 (!%p128_p9), 127, %v271_v35  ;;  %s151_s30 = sand.u32 (!%p128_p9), 1, %s772_s10   ;;  %s636_s4 = sshll.u32 (!%p128_p9), %s821_s13, 7 }
  0x10   : > { %s621_s3 = sshll.u32 (!%p128_p9), %s151_s30, 3  ;;  %s1069_s17 = scalar_lea.hbm (!%p128_p9), %s1113_s2, %s636_s4 }
  0x11   : > { %s153_s6 = scalar_lea.vmem (!%p128_p9), [#allocation2], %s621_s3  ;;  %s533_s13 = scalar_lea.sflag (!%p128_p9), [#allocation3], %s151_s30 }
  0x12   : > { %s546_s7 = sshll.u32 (!%p128_p9), %s153_s6, 4  ;;  %s1071_s7 = int_to_ptr.vmem [resolvable:$true] %s546_s7 }
  0x15   : > { %s1137_s21 = smov (!%p155_p10, %s622_s21), 15 }
  0x16   : > { %s623_s22 = sshll.u32 %s1137_s21, 3  ;;  %s718_s21 = scalar_lea.vmem %s1071_s7, 128 }
  0x17   : > { %s158_s25 = scalar_lea.vmem %s1111_s0, %s623_s22  ;;  %s164_s28 = scalar_lea.vmem %s1112_s1, %s623_s22 }
  0x18   : > { %v168_v1 = vld [vmem:[%s158_s25 + $0x10] sm:$0xff]  ;;  %v166_v2 = vld [vmem:[%s158_s25] sm:$0xff]  ;;  %v169_v3 = vld [vmem:[%s158_s25 + $0x18] sm:$0xff]  ;;  %p719_p11 = scmp.ne.s32.totalorder %s1071_s7, %s718_s21  ;;  %s784_s22 = smov [#allocation2]  }
  0x19   : > { %v189_v4 = vsel %vm182_vm0, %v168_v1, -inf  ;;  %v183_v5 = vsel %vm182_vm0, %v166_v2, -inf  ;;  %v167_v6 = vld [vmem:[%s158_s25 + $0x8] sm:$0xff]  ;;  %v192_v7 = vsel %vm182_vm0, %v169_v3, -inf  ;;  %v170_v10 = vld [vmem:[%s158_s25 + $0x20] sm:$0xff]  ;;  %v861_v13 = vld [vmem:[%s158_s25 + $0x38] sm:$0xff] }
  0x1a   : > { %190 = vmax.xlane.f32.xlu1 %v189_v4  ;;  %184 = vmax.xlane.f32.xlu0 %v183_v5  ;;  %v186_v8 = vsel %vm182_vm0, %v167_v6, -inf  ;;  %v171_v9 = vld [vmem:[%s158_s25 + $0x28] sm:$0xff]  ;;  %v195_v12 = vsel %vm182_vm0, %v170_v10, -inf  ;;  %v172_v14 = vld [vmem:[%s158_s25 + $0x30] sm:$0xff]  ;;  %v204_v15 = vsel %vm182_vm0, %v861_v13, -inf  ;;  %v874_v19 = vld [vmem:[%s164_s28] sm:$0xff]  ;;  %p720_p12 = pnand %p719_p11, %p838_p5 }
  0x1b   : > { %v198_v11 = vsel %vm182_vm0, %v171_v9, -inf  ;;  %v201_v16 = vsel %vm182_vm0, %v172_v14, -inf  ;;  %v869_v17 = vld [vmem:[%s164_s28 + $0x8] sm:$0xff]  ;;  %v872_v18 = vld [vmem:[%s164_s28 + $0x10] sm:$0xff]  ;;  %v878_v20 = vld [vmem:[%s164_s28 + $0x18] sm:$0xff]  ;;  %vm436_vm10 = vcmp.ne.s32.totalorder %v874_v19, 4294967196 }
  0x1c   : > { %v881_v21 = vld [vmem:[%s164_s28 + $0x20] sm:$0xff]  ;;  %v884_v22 = vld [vmem:[%s164_s28 + $0x28] sm:$0xff]  ;;  %v887_v23 = vld [vmem:[%s164_s28 + $0x30] sm:$0xff]  ;;  %vm437_vm8 = vcmp.ne.s32.totalorder %v869_v17, 4294967196  ;;  %vm438_vm15 = vcmp.ne.s32.totalorder %v872_v18, 4294967196  ;;  %p721_p13 = pneg %p720_p12  ;;  %s722_s23 = sshll.u32 %s784_s22, 4  ;;  %s723_s23 = int_to_ptr.vmem [resolvable:$false] %s722_s23 }
  0x1d   : > { %v890_v24 = vld [vmem:[%s164_s28 + $0x38] sm:$0xff]  ;;  %s724_s24 = scalar_lea.vmem %s723_s23, 256  ;;  %p725_p0 = scmp.lt.s32.totalorder %s1071_s7, %s723_s23 }
  0x1e   : > { %193 = vmax.xlane.f32.xlu1 %v192_v7  ;;  %187 = vmax.xlane.f32.xlu0 %v186_v8  ;;  %p726_p1 = scmp.lt.s32.totalorder %s724_s24, %s718_s21 }
  0x20   : > { %p727_p2 = por %p726_p1, %p725_p0 }
  0x22   : > { %199 = vmax.xlane.f32.xlu1 %v198_v11  ;;  %196 = vmax.xlane.f32.xlu0 %v195_v12  ;;  %p728_p3 = pnand %p727_p2, %p721_p13 }
  0x26   : > { %205 = vmax.xlane.f32.xlu1 %v204_v15  ;;  %202 = vmax.xlane.f32.xlu0 %v201_v16  ;;  %v927_v16 = vshrl.u32 %v271_v35, 7 }
  0x37   : > { %277 = vperm.xlu1 %685, %v869_v17  }
  0x3b   : > { %280 = vperm.xlu1 %685, %v872_v18  }
  0x3c   : > { %274 = vperm.xlu0 %684, %v874_v19  }
  0x3f   : > { %283 = vperm.xlu1 %685, %v878_v20  }
  0x43   : > { %286 = vperm.xlu1 %685, %v881_v21  }
  0x47   : > { %289 = vperm.xlu1 %685, %v884_v22  }
  0x4b   : > { %292 = vperm.xlu1 %685, %v887_v23  }
  0x4f   : > { %295 = vperm.xlu1 %685, %v890_v24  }
  0xa7   : > { %v191_v25 = vpop.xlane.xlu1 %190  ;;  %v185_v26 = vpop.xlane.xlu0 %184 }
  0xa8   : > { %v207_v27 = vsub.f32 %v166_v2, %v185_v26  ;;  %v209_v32 = vsub.f32 %v168_v1, %v191_v25 }
  0xaa   : > { %v345_v28 = vsel %vm182_vm0, %v207_v27, 0.0  ;;  %v351_v39 = vsel %vm182_vm0, %v209_v32, 0.0  ;;  %v219_v41 = vmul.f32 1.442695, %v209_v32  ;;  %v215_v43 = vmul.f32 1.442695, %v207_v27 }
  0xab   : > { %v194_v29 = vpop.xlane.xlu1 %193  ;;  %v188_v30 = vpop.xlane.xlu0 %187  ;;  %346 = vadd.xlane.f32.xlu1 %v345_v28 }
  0xac   : > { %v208_v31 = vsub.f32 %v167_v6, %v188_v30  ;;  %v210_v38 = vsub.f32 %v169_v3, %v194_v29  ;;  %v411_v29 = vadd.s32 8, %v927_v16  ;;  %v933_v30 = vstv %s626_s29 }
  0xae   : > { %v348_v33 = vsel %vm182_vm0, %v208_v31, 0.0  ;;  %v217_v37 = vmul.f32 1.442695, %v208_v31  ;;  %v354_v46 = vsel %vm182_vm0, %v210_v38, 0.0  ;;  %v221_v47 = vmul.f32 1.442695, %v210_v38 }
  0xaf   : > { %v200_v34 = vpop.xlane.xlu1 %199  ;;  %349 = vadd.xlane.f32.xlu0 %v348_v33  ;;  %v197_v36 = vpop.xlane.xlu0 %196  ;;  %v421_v33 = vadd.s32 %v933_v30, %v411_v29 }
  0xb0   : > { %686 = vpow2.f32 %v217_v37  ;;  %v899_v44 = vsub.f32 %v170_v10, %v197_v36  ;;  %v902_v49 = vsub.f32 %v171_v9, %v200_v34  ;;  %v412_v36 = vadd.s32 16, %v927_v16 }
  0xb1   : > { %688 = vpow2.f32 %v219_v41  ;;  %v420_v37 = vadd.s32 %v933_v30, %v927_v16  ;;  %vm429_vm7 = vcmp.lt.s32.totalorder %v421_v33, 128 }
  0xb2   : > { %690 = vpow2.f32 %v215_v43  ;;  %v223_v50 = vmul.f32 1.442695, %v899_v44  ;;  %v225_v56 = vmul.f32 1.442695, %v902_v49  ;;  %v422_v43 = vadd.s32 %v933_v30, %v412_v36  ;;  %vm954_vm12 = vmand %vm429_vm7, %vm437_vm8 }
  0xb3   : > { %v206_v40 = vpop.xlane.xlu1 %205  ;;  %352 = vadd.xlane.f32.xlu0 %v351_v39  ;;  %v203_v45 = vpop.xlane.xlu0 %202  ;;  %692 = vpow2.f32 %v221_v47  ;;  %v360_v39 = vsel %vm182_vm0, %v902_v49, 0.0  ;;  %vm428_vm9 = vcmp.lt.s32.totalorder %v420_v37, 128  ;;  %vm440_vm8 = vcmp.ne.s32.totalorder %v881_v21, 4294967196 }
  0xb4   : > { %v906_v51 = vsub.f32 %v172_v14, %v203_v45  ;;  %v911_v57 = vsub.f32 %v861_v13, %v206_v40  ;;  %694 = vpow2.f32 %v223_v50  ;;  %v413_v40 = vadd.s32 24, %v927_v16  ;;  %vm961_vm13 = vmand %vm428_vm9, %vm436_vm10 }
  0xb5   : > { %696 = vpow2.f32 %v225_v56  ;;  %vm430_vm14 = vcmp.lt.s32.totalorder %v422_v43, 128  ;;  %v783_v50 = vmov 0.0   ;;  %v415_v56 = vadd.s32 40, %v927_v16 }
  0xb6   : > { %v227_v58 = vmul.f32 1.442695, %v906_v51  ;;  %v229_v1 = vmul.f32 1.442695, %v911_v57  ;;  %vm441_vm10 = vcmp.ne.s32.totalorder %v884_v22, 4294967196 }
  0xb7   : > { %v278_v48 = vpop.permute.xlu1 %277  ;;  %355 = vadd.xlane.f32.xlu0 %v354_v46  ;;  %v363_v46 = vsel %vm182_vm0, %v906_v51, 0.0 }
  0xb8   : > { %vm298_vm1 = vcmp.eq.s32.totalorder %v897_v42, %v278_v48  ;;  %698 = vpow2.f32 %v227_v58  ;;  %v414_v48 = vadd.s32 32, %v927_v16 }
  0xb9   : > { %v306_v52 = vsel %vm298_vm1, %v208_v31, 0.0  ;;  %700 = vpow2.f32 %v229_v1 }
  0xba   : > { %v316_v53 = vsel %vm182_vm0, %v306_v52, 0.0  ;;  %v687_v63 = vpop.eup %686  ;;  %v628_v52 = vsel %vm954_vm12, 1.0, %v783_v50 }
  0xbb   : > { %v281_v54 = vpop.permute.xlu1 %280  ;;  %317 = vadd.xlane.f32.xlu1 %v316_v53  ;;  %v275_v55 = vpop.permute.xlu0 %274  ;;  %v234_v5 = vsel %vm182_vm0, %v687_v63, 0.0  ;;  %v627_v53 = vsel %vm961_vm13, 1.0, %v783_v50  ;;  %v425_v63 = vadd.s32 %v933_v30, %v415_v56 }
  0xbc   : > { %vm299_vm2 = vcmp.eq.s32.totalorder %v897_v42, %v281_v54  ;;  %vm297_vm3 = vcmp.eq.s32.totalorder %v897_v42, %v275_v55  ;;  %v689_v3 = vpop.eup %688 }
  0xbd   : > { %v307_v59 = vsel %vm299_vm2, %v209_v32, 0.0  ;;  %v305_v60 = vsel %vm297_vm3, %v207_v27, 0.0  ;;  %v691_v6 = vpop.eup %690  ;;  %v237_v9 = vsel %vm182_vm0, %v689_v3, 0.0  ;;  %v357_v32 = vsel %vm182_vm0, %v899_v44, 0.0  ;;  %vm977_vm3 = vmand %vm430_vm14, %vm438_vm15 }
  0xbe   : > { %v319_v61 = vsel %vm182_vm0, %v307_v59, 0.0  ;;  %v313_v62 = vsel %vm182_vm0, %v305_v60, 0.0  ;;  %v693_v7 = vpop.eup %692  ;;  %v231_v8 = vsel %vm182_vm0, %v691_v6, 0.0  ;;  %vm460_vm2 = vcmask 7168  }
  0xbf   : > { %v284_v0 = vpop.permute.xlu1 %283  ;;  %320 = vadd.xlane.f32.xlu1 %v319_v61  ;;  %314 = vadd.xlane.f32.xlu0 %v313_v62  ;;  %v695_v10 = vpop.eup %694  ;;  %v240_v13 = vsel %vm182_vm0, %v693_v7, 0.0  ;;  %v502_v58 = vsel %vm460_vm2, %v628_v52, 0.0  ;;  %v501_v59 = vsel %vm460_vm2, %v627_v53, 0.0  ;;  %v629_v60 = vsel %vm977_vm3, 1.0, %v783_v50 }
  0xc0   : > { %vm300_vm4 = vcmp.eq.s32.totalorder %v897_v42, %v284_v0  ;;  %v697_v12 = vpop.eup %696  ;;  %v243_v14 = vsel %vm182_vm0, %v695_v10, 0.0  ;;  %v504_v0 = vsel %vm460_vm2, %v629_v60, 0.0  ;;  %v417_v3 = vadd.s32 56, %v927_v16 }
  0xc1   : > { %v308_v2 = vsel %vm300_vm4, %v210_v38, 0.0  ;;  %v246_v26 = vsel %vm182_vm0, %v697_v12, 0.0  ;;  %vm442_vm15 = vcmp.ne.s32.totalorder %v887_v23, 4294967196 }
  0xc2   : > { %v322_v4 = vsel %vm182_vm0, %v308_v2, 0.0  ;;  %v699_v15 = vpop.eup %698 }
  0xc3   : > { %323 = vadd.xlane.f32.xlu1 %v322_v4  ;;  %235 = vadd.xlane.f32.xlu0 %v234_v5  ;;  %v287_v11 = vpop.permute.xlu1 %286  ;;  %v249_v27 = vsel %vm182_vm0, %v699_v15, 0.0  ;;  %v701_v28 = vpop.eup %700 }
  0xc4   : > { %vm301_vm5 = vcmp.eq.s32.totalorder %v897_v42, %v287_v11  ;;  %v252_v31 = vsel %vm182_vm0, %v701_v28, 0.0 }
  0xc5   : > { %v309_v35 = vsel %vm301_vm5, %v899_v44, 0.0  ;;  %vm439_vm5 = vcmp.ne.s32.totalorder %v878_v20, 4294967196  ;;  %v503_v20 = vadd.f32 %v502_v58, %v501_v59 }
  0xc6   : > { %v325_v38 = vsel %vm182_vm0, %v309_v35, 0.0 }
  0xc7   : > { %232 = vadd.xlane.f32.xlu1 %v231_v8  ;;  %238 = vadd.xlane.f32.xlu0 %v237_v9  ;;  %v290_v25 = vpop.permute.xlu1 %289  ;;  %v505_v4 = vadd.f32 %v504_v0, %v503_v20  ;;  %v427_v8 = vadd.s32 %v933_v30, %v417_v3 }
  0xc8   : > { %vm302_vm6 = vcmp.eq.s32.totalorder %v897_v42, %v290_v25 }
  0xc9   : > { %v310_v41 = vsel %vm302_vm6, %v902_v49, 0.0  ;;  %v423_v49 = vadd.s32 %v933_v30, %v413_v40 }
  0xca   : > { %v328_v17 = vsel %vm182_vm0, %v310_v41, 0.0 }
  0xcb   : > { %241 = vadd.xlane.f32.xlu1 %v240_v13  ;;  %244 = vadd.xlane.f32.xlu0 %v243_v14  ;;  %v293_v34 = vpop.permute.xlu1 %292  ;;  %vm431_vm4 = vcmp.lt.s32.totalorder %v423_v49, 128 }
  0xcc   : > { %vm303_vm11 = vcmp.eq.s32.totalorder %v897_v42, %v293_v34  ;;  %vm990_vm6 = vmand %vm431_vm4, %vm439_vm5  ;;  %vm435_vm4 = vcmp.lt.s32.totalorder %v427_v8, 128  ;;  %vm443_vm5 = vcmp.ne.s32.totalorder %v890_v24, 4294967196 }
  0xcd   : > { %v311_v19 = vsel %vm303_vm11, %v906_v51, 0.0  ;;  %v366_v51 = vsel %vm182_vm0, %v911_v57, 0.0  ;;  %v630_v1 = vsel %vm990_vm6, 1.0, %v783_v50 }
  0xce   : > { %v331_v54 = vsel %vm182_vm0, %v311_v19, 0.0  ;;  %v506_v21 = vsel %vm460_vm2, %v630_v1, 0.0 }
  0xcf   : > { %247 = vadd.xlane.f32.xlu1 %v246_v26  ;;  %250 = vadd.xlane.f32.xlu0 %v249_v27  ;;  %v296_v44 = vpop.permute.xlu1 %295  ;;  %v507_v9 = vadd.f32 %v506_v21, %v505_v4 }
  0xd0   : > { %vm304_vm1 = vcmp.eq.s32.totalorder %v897_v42, %v296_v44  ;;  %v424_v42 = vadd.s32 %v933_v30, %v414_v48 }
  0xd1   : > { %v312_v18 = vsel %vm304_vm1, %v911_v57, 0.0  ;;  %v416_v57 = vadd.s32 48, %v927_v16 }
  0xd2   : > { %v334_v61 = vsel %vm182_vm0, %v312_v18, 0.0  ;;  %vm432_vm7 = vcmp.lt.s32.totalorder %v424_v42, 128  ;;  %vm433_vm0 = vcmp.lt.s32.totalorder %v425_v63, 128 }
  0xd3   : > { %253 = vadd.xlane.f32.xlu1 %v252_v31  ;;  %358 = vadd.xlane.f32.xlu0 %v357_v32  ;;  %vm1000_vm9 = vmand %vm432_vm7, %vm440_vm8  ;;  %v426_v5 = vadd.s32 %v933_v30, %v416_v57 }
  0xd4   : > { %v631_v6 = vsel %vm1000_vm9, 1.0, %v783_v50  ;;  %vm1010_vm11 = vmand %vm433_vm0, %vm441_vm10 }
  0xd5   : > { %vm434_vm14 = vcmp.lt.s32.totalorder %v426_v5, 128  ;;  %v508_v10 = vsel %vm460_vm2, %v631_v6, 0.0  ;;  %v632_v22 = vsel %vm1010_vm11, 1.0, %v783_v50  ;;  %vm1027_vm7 = vmand %vm435_vm4, %vm443_vm5 }
  0xd6   : > { %vm1019_vm1 = vmand %vm434_vm14, %vm442_vm15  ;;  %v509_v12 = vadd.f32 %v508_v10, %v507_v9  ;;  %v510_v13 = vsel %vm460_vm2, %v632_v22, 0.0  ;;  %v634_v25 = vsel %vm1027_vm7, 1.0, %v783_v50 }
  0xd7   : > { %326 = vadd.xlane.f32.xlu1 %v325_v38  ;;  %361 = vadd.xlane.f32.xlu0 %v360_v39  ;;  %v633_v14 = vsel %vm1019_vm1, 1.0, %v783_v50  ;;  %v514_v28 = vsel %vm460_vm2, %v634_v25, 0.0 }
  0xd8   : > { %v511_v15 = vadd.f32 %v510_v13, %v509_v12  ;;  %v512_v26 = vsel %vm460_vm2, %v633_v14, 0.0 }
  0xda   : > { %v513_v27 = vadd.f32 %v512_v26, %v511_v15 }
  0xdb   : > { %329 = vadd.xlane.f32.xlu1 %v328_v17  ;;  %364 = vadd.xlane.f32.xlu0 %v363_v46 }
  0xdc   : > { %v515_v24 = vadd.f32 %v514_v28, %v513_v27 }
  0xdf   : > { %332 = vadd.xlane.f32.xlu1 %v331_v54  ;;  %367 = vadd.xlane.f32.xlu0 %v366_v51 }
  0xe3   : > { %335 = vadd.xlane.f32.xlu1 %v334_v61 }
  0xe7   : > { %516 = vadd.xlane.f32.xlu1 %v515_v24 }
 0x138   : > { %v347_v31 = vpop.xlane.xlu1 %346 }
 0x139   : > { %v369_v52 = vmul.f32 0.0625, %v347_v31 }
 0x13c   : > { %v350_v29 = vpop.xlane.xlu0 %349 }
 0x13d   : > { %v370_v44 = vmul.f32 0.0625, %v350_v29 }
 0x140   : > { %v353_v30 = vpop.xlane.xlu0 %352 }
 0x141   : > { %v371_v58 = vmul.f32 0.0625, %v353_v30 }
 0x144   : > { %v356_v32 = vpop.xlane.xlu0 %355 }
 0x145   : > { %v372_v10 = vmul.f32 0.0625, %v356_v32 }
 0x148   : > { %v318_v33 = vpop.xlane.xlu1 %317 }
 0x14c   : > { %v321_v34 = vpop.xlane.xlu1 %320  ;;  %v315_v35 = vpop.xlane.xlu0 %314 }
 0x150   : > { %v1035_v36 = vpop.xlane.xlu1 %323  ;;  %v236_v37 = vpop.xlane.xlu0 %235 }
 0x151   : > { %702 = vlog2.f32 %v236_v37 }
 0x154   : > { %v233_v38 = vpop.xlane.xlu1 %232  ;;  %v239_v39 = vpop.xlane.xlu0 %238 }
 0x155   : > { %704 = vlog2.f32 %v233_v38 }
 0x156   : > { %706 = vlog2.f32 %v239_v39 }
 0x158   : > { %v242_v40 = vpop.xlane.xlu1 %241  ;;  %v245_v41 = vpop.xlane.xlu0 %244 }
 0x159   : > { %708 = vlog2.f32 %v242_v40 }
 0x15a   : > { %710 = vlog2.f32 %v245_v41 }
 0x15b   : > { %v703_v43 = vpop.eup %702 }
 0x15c   : > { %v258_v17 = vmul.f32 0.6931472, %v703_v43  ;;  %v248_v46 = vpop.xlane.xlu1 %247  ;;  %v251_v48 = vpop.xlane.xlu0 %250 }
 0x15d   : > { %712 = vlog2.f32 %v248_v46 }
 0x15e   : > { %v338_v19 = vsub.f32 %v258_v17, %v318_v33  ;;  %v378_v49 = vsub.f32 %v258_v17, %v370_v44  ;;  %714 = vlog2.f32 %v251_v48 }
 0x15f   : > { %v705_v50 = vpop.eup %704 }
 0x160   : > { %v707_v53 = vpop.eup %706  ;;  %v386_v54 = vmul.f32 0.9, %v338_v19  ;;  %v394_v51 = vmul.f32 0.1, %v378_v49  ;;  %v256_v18 = vmul.f32 0.6931472, %v705_v50  ;;  %v254_v42 = vpop.xlane.xlu1 %253 }
 0x161   : > { %v359_v56 = vpop.xlane.xlu0 %358  ;;  %v260_v59 = vmul.f32 0.6931472, %v707_v53  ;;  %716 = vlog2.f32 %v254_v42 }
 0x162   : > { %v402_v60 = vadd.f32 %v394_v51, %v386_v54  ;;  %v337_v61 = vsub.f32 %v256_v18, %v315_v35  ;;  %v377_v57 = vsub.f32 %v256_v18, %v369_v52  ;;  %v373_v26 = vmul.f32 0.0625, %v359_v56 }
 0x163   : > { %v709_v20 = vpop.eup %708  ;;  %v339_v63 = vsub.f32 %v260_v59, %v321_v34  ;;  %v379_v0 = vsub.f32 %v260_v59, %v371_v58 }
 0x164   : > { %v711_v1 = vpop.eup %710  ;;  %v453_v3 = vsel %vm954_vm12, %v402_v60, 0.0  ;;  %v385_v4 = vmul.f32 0.9, %v337_v61  ;;  %v393_v5 = vmul.f32 0.1, %v377_v57  ;;  %v327_v21 = vpop.xlane.xlu1 %326  ;;  %vm526_vm12 = vcmp.eq.s32.totalorder %v927_v16, 1 }
 0x165   : > { %v362_v6 = vpop.xlane.xlu0 %361  ;;  %v387_v8 = vmul.f32 0.9, %v339_v63  ;;  %v395_v9 = vmul.f32 0.1, %v379_v0  ;;  %v262_v12 = vmul.f32 0.6931472, %v709_v20 }
 0x166   : > { %v401_v22 = vadd.f32 %v393_v5, %v385_v4  ;;  %v264_v13 = vmul.f32 0.6931472, %v711_v1  ;;  %v462_v15 = vsel %vm460_vm2, %v453_v3, 0.0  ;;  %v374_v27 = vmul.f32 0.0625, %v362_v6 }
 0x167   : > { %v713_v14 = vpop.eup %712  ;;  %v403_v25 = vadd.f32 %v395_v9, %v387_v8  ;;  %v340_v24 = vsub.f32 %v262_v12, %v1035_v36  ;;  %v380_v29 = vsub.f32 %v262_v12, %v372_v10 }
 0x168   : > { %v715_v28 = vpop.eup %714  ;;  %v452_v45 = vsel %vm961_vm13, %v401_v22, 0.0  ;;  %v266_v30 = vmul.f32 0.6931472, %v713_v14  ;;  %v330_v31 = vpop.xlane.xlu1 %329  ;;  %v381_v37 = vsub.f32 %v264_v13, %v373_v26  ;;  %v341_v44 = vsub.f32 %v264_v13, %v327_v21 }
 0x169   : > { %v365_v33 = vpop.xlane.xlu0 %364  ;;  %v461_v32 = vsel %vm460_vm2, %v452_v45, 0.0  ;;  %v454_v34 = vsel %vm977_vm3, %v403_v25, 0.0  ;;  %v268_v35 = vmul.f32 0.6931472, %v715_v28  ;;  %v388_v40 = vmul.f32 0.9, %v340_v24 }
 0x16a   : > { %v463_v38 = vadd.f32 %v462_v15, %v461_v32  ;;  %v464_v39 = vsel %vm460_vm2, %v454_v34, 0.0  ;;  %v396_v41 = vmul.f32 0.1, %v380_v29  ;;  %v397_v43 = vmul.f32 0.1, %v381_v37 }
 0x16b   : > { %v717_v47 = vpop.eup %716  ;;  %v382_v36 = vsub.f32 %v266_v30, %v374_v27  ;;  %v342_v17 = vsub.f32 %v266_v30, %v330_v31  ;;  %v375_v49 = vmul.f32 0.0625, %v365_v33  ;;  %v389_v55 = vmul.f32 0.9, %v341_v44 }
 0x16c   : > { %v404_v46 = vadd.f32 %v396_v41, %v388_v40  ;;  %v270_v48 = vmul.f32 0.6931472, %v717_v47  ;;  %v465_v19 = vadd.f32 %v464_v39, %v463_v38  ;;  %v333_v50 = vpop.xlane.xlu1 %332  ;;  %vm525_vm13 = vcmp.eq.s32.totalorder %v927_v16, 0 }
 0x16d   : > { %v368_v52 = vpop.xlane.xlu0 %367  ;;  %v398_v53 = vmul.f32 0.1, %v382_v36  ;;  %v390_v54 = vmul.f32 0.9, %v342_v17  ;;  %v343_v51 = vsub.f32 %v268_v35, %v333_v50  ;;  %v383_v42 = vsub.f32 %v268_v35, %v375_v49 }
 0x16e   : > { %v455_v18 = vsel %vm990_vm6, %v404_v46, 0.0  ;;  %v376_v56 = vmul.f32 0.0625, %v368_v52  ;;  %v405_v58 = vadd.f32 %v397_v43, %v389_v55 }
 0x16f   : > { %v466_v59 = vsel %vm460_vm2, %v455_v18, 0.0  ;;  %v406_v60 = vadd.f32 %v398_v53, %v390_v54  ;;  %v391_v61 = vmul.f32 0.9, %v343_v51  ;;  %v399_v20 = vmul.f32 0.1, %v383_v42 }
 0x170   : > { %v467_v57 = vadd.f32 %v466_v59, %v465_v19  ;;  %v384_v63 = vsub.f32 %v270_v48, %v376_v56  ;;  %v336_v0 = vpop.xlane.xlu1 %335  ;;  %v456_v1 = vsel %vm1000_vm9, %v405_v58, 0.0 }
 0x171   : > { %v457_v3 = vsel %vm1010_vm11, %v406_v60, 0.0  ;;  %v344_v4 = vsub.f32 %v270_v48, %v336_v0  ;;  %v468_v62 = vsel %vm460_vm2, %v456_v1, 0.0  ;;  %v407_v21 = vadd.f32 %v399_v20, %v391_v61 }
 0x172   : > { %v470_v5 = vsel %vm460_vm2, %v457_v3, 0.0  ;;  %v469_v6 = vadd.f32 %v468_v62, %v467_v57  ;;  %v400_v8 = vmul.f32 0.1, %v384_v63 }
 0x173   : > { %v392_v9 = vmul.f32 0.9, %v344_v4  ;;  %v458_v10 = vsel %vm1019_vm1, %v407_v21, 0.0 }
 0x174   : > { %v471_v12 = vadd.f32 %v470_v5, %v469_v6  ;;  %v472_v2 = vsel %vm460_vm2, %v458_v10, 0.0  ;;  %v517_v25 = vpop.xlane.xlu1 %516 }
 0x175   : > { %v408_v22 = vadd.f32 %v400_v8, %v392_v9  ;;  %v518_v26 = vrot.slane %v517_v25, 4 }
 0x176   : > { %v473_v13 = vadd.f32 %v472_v2, %v471_v12 }
 0x177   : > { %v459_v7 = vsel %vm1027_vm7, %v408_v22, 0.0  ;;  %v519_v27 = vadd.f32 %v518_v26, %v517_v25 }
 0x178   : > { %v474_v14 = vsel %vm460_vm2, %v459_v7, 0.0 }
 0x179   : > { %v475_v15 = vadd.f32 %v474_v14, %v473_v13  ;;  %v520_v28 = vrot.slane %v519_v27, 2 }
 0x17b   : > { %476 = vadd.xlane.f32.xlu0 %v475_v15  ;;  %v521_v29 = vadd.f32 %v520_v28, %v519_v27 }
 0x17d   : > { %v522_v33 = vrot.slane %v521_v29, 1 }
 0x17f   : > { %v523_v34 = vadd.f32 %v522_v33, %v521_v29 }
 0x208   : > { %v477_v11 = vpop.xlane.xlu0 %476 }
 0x209   : > { %v478_v45 = vrot.slane %v477_v11, 4 }
 0x20b   : > { %v479_v24 = vadd.f32 %v478_v45, %v477_v11 }
 0x20d   : > { %v480_v30 = vrot.slane %v479_v24, 2 }
 0x20f   : > { %v481_v31 = vadd.f32 %v480_v30, %v479_v24 }
 0x211   : > { %v482_v23 = vrot.slane %v481_v31, 1 }
 0x213   : > { %v483_v32 = vadd.f32 %v482_v23, %v481_v31 }
 0x215   : > { %639 = vpush %v483_v32 }
 0x216   : > { %641 = vpush %v523_v34 }
 0x246   : > { %s640_s5 = spop %639 }
 0x247   : > { %v529_v35 = vstv %s640_s5  ;;  %s642_s8 = spop %641 }
 0x248   : > { %v527_v37 = vstv %s642_s8 }
 0x249   : > { %v528_v38 = vsel %vm526_vm12, %v527_v37, 0.0 }
 0x24a   : > { %v530_v39 = vsel %vm525_vm13, %v529_v35, %v528_v38 }
 0x24b   : > { %531 = vst [vmem:[%s153_s6] sm:$0xff] %v530_v39 }
 0x24c   : > { %731 = shalt.err (!%p728_p3)
}
 0x24d   : > { %s732_s25 = scalar_lea.hbm %s1069_s17, 128  ;;  %s736_s28 = scalar_lea.hbm %s1113_s2, 256 }
 0x24e   : > { %p733_p4 = scmp.ne.s32.totalorder %s1069_s17, %s732_s25  ;;  %p737_p9 = scmp.lt.u32.totalorder %s1069_s17, %s1113_s2 }
 0x24f   : > { %p738_p10 = scmp.lt.u32.totalorder %s736_s28, %s732_s25  ;;  %p740_p12 = scmp.lt.u32.totalorder %s732_s25, %s1069_s17 }
 0x250   : > { %p734_p7 = pnand %p733_p4, %p838_p5 }
 0x251   : > { %p739_p11 = por %p738_p10, %p737_p9 }
 0x252   : > { %p735_p8 = pneg %p734_p7 }
 0x253   : > { %p741_p13 = por %p740_p12, %p739_p11 }
 0x255   : > { %p742_p0 = pnand %p741_p13, %p735_p8 }
 0x257   : > { %745 = shalt.err (!%p742_p0)
}
 0x258   : > { %643 = dma.vmem_to_hbm [thread:$0]  (%p838_p5), %s1071_s7, 128, %s1069_s17, %s533_s13  }
 0x259 PF: > { %p649_p1 = scmp.ge.s32.totalorder %s780_s12, 2  ;;  %s558_s3 = sand.u32 1, %s768_s9  }
 0x25a   : > { %s559_s4 = scalar_lea.sflag [#allocation3], %s558_s3 }
 0x25b   : > { %p646_p2 = pnand %p649_p1, %p842_p6 }
 0x25d   : > { %763 = dma.done.wait (!%p646_p2), %s559_s4, 128  }
 0x25e   : > { %765 = vsyncadd (!%p646_p2), %s559_s4, 4294967168  ;;  %p12_p3 = scmp.ge.s32.totalorder %s825_s15, 4   ;;  %s1132_s9 = smov %s772_s10 }
 0x25f   : > { %s1133_s10 = smov %s776_s11  ;;  %s1134_s11 = smov %s836_s18 }
 0x260   : > { %s1135_s12 = smov %s825_s15  ;;  %14 = sbr.rel (!%p12_p3) target bundleno = 3 (0x3), region = 66 }
 0x267   :  { %564 = vsyncpa [#allocation3], 1 }
 0x268   :  { %566 = vsyncpa [#allocation3 + $0x1], 1 }

</bundles_post_ra>
